<compile_context>
chip_gen: v7x
topology: tpu7x:2x2x1
jax: 0.10.0
libtpu: 0.0.40
codegen_flags: <defaults>
</compile_context>

<pallas_src>
import functools

import jax
import jax.numpy as jnp
from jax.experimental import pallas as pl
from jax.experimental.pallas import tpu as pltpu

HIDDEN = 512
BN_EPS = 1e-5


def _bn_relu_folded(h, gamma, beta):
    """Training-mode BatchNorm1d folded into one (1, C) scale/shift, then ReLU.

    h is f32; statistics are computed in f32 over the batch axis (biased var).
    """
    mu = jnp.mean(h, axis=0, keepdims=True)
    d = h - mu
    var = jnp.mean(d * d, axis=0, keepdims=True)        # biased variance
    scale = gamma * jax.lax.rsqrt(var + BN_EPS)          # (1, C)
    shift = beta - mu * scale                            # (1, C)
    return jnp.maximum(h * scale + shift, 0.0)


def mixer_kernel(x_ref, w1_ref, w2_ref, w3_ref, bn_ref, b3_ref, o_ref):
    # x already includes the N(0, 0.01) noise (added in the wrapper; the on-chip
    # PRNG primitive is TPU-Mosaic-only and broke the interpreter run).
    x = x_ref[...].astype(jnp.float32)

    # ---- layer 1: relu(bn1(linear1(x))) -------------------------------------
    # NOTE: the linear biases b1/b2 are exactly cancelled by training-mode BN's
    # mean subtraction (constant over the batch), so they are omitted here.
    h = jnp.dot(x.astype(jnp.bfloat16), w1_ref[...],
                preferred_element_type=jnp.float32)
    h = _bn_relu_folded(h, bn_ref[0:1, :], bn_ref[1:2, :])

    # ---- layer 2: relu(bn2(linear2(h))) -------------------------------------
    h = jnp.dot(h.astype(jnp.bfloat16), w2_ref[...],
                preferred_element_type=jnp.float32)
    h = _bn_relu_folded(h, bn_ref[2:3, :], bn_ref[3:4, :])

    # ---- layer 3: linear3 ----------------------------------------------------
    h = jnp.dot(h.astype(jnp.bfloat16), w3_ref[...],
                preferred_element_type=jnp.float32) + b3_ref[...]
    o_ref[...] = h.astype(o_ref.dtype)


@functools.partial(jax.jit, static_argnames=("s", "z", "ngen"))
def mixer_forward(x, noise_key, params, *, s, z, ngen):
    """Runs the Mixer forward pass. Returns w of shape (ngen, B, z)."""
    x2d = x.reshape(-1, s).astype(jnp.float32)
    B = x2d.shape[0]

    # x = torch.zeros_like(x).normal_(0, 0.01) + x
    # (noise generated outside the kernel and fused into the input)
    x2d = x2d + 0.01 * jax.random.normal(noise_key, x2d.shape, jnp.float32)

    # Pack the four tiny BN vectors into a single (4, HIDDEN) array -> one DMA.
    bn_packed = jnp.concatenate(
        [params["g1"], params["bb1"], params["g2"], params["bb2"]],
        axis=0).astype(jnp.float32)

    vmem = pl.BlockSpec(memory_space=pltpu.MemorySpace.VMEM)

    out2d = pl.pallas_call(
        mixer_kernel,
        out_shape=jax.ShapeDtypeStruct((B, ngen * z), jnp.float32),
        in_specs=[vmem, vmem, vmem, vmem, vmem, vmem],
        out_specs=vmem,
    )(x2d,
      params["w1"], params["w2"], params["w3"],
      bn_packed, params["b3"])

    # x.view(-1, ngen, z); torch.stack([x[:, i] ...]) -> (ngen, B, z).
    # Kept outside the kernel so the kernel output stays lane-dense (128-wide).
    return out2d.reshape(B, ngen, z).transpose(1, 0, 2)


def init_params(key, s, z, ngen):
    """Deterministic synthetic parameters (shapes match the PyTorch module)."""
    ks = jax.random.split(key, 6)
    scale1 = 1.0 / jnp.sqrt(s)
    scale2 = 1.0 / jnp.sqrt(HIDDEN)
    params = {
        # Linear weights stored as (in, out) == W.T relative to PyTorch, in bf16.
        "w1": jax.random.uniform(ks[0], (s, HIDDEN), jnp.float32,
                                 -scale1, scale1).astype(jnp.bfloat16),
        "w2": jax.random.uniform(ks[2], (HIDDEN, HIDDEN), jnp.float32,
                                 -scale2, scale2).astype(jnp.bfloat16),
        "w3": jax.random.uniform(ks[4], (HIDDEN, z * ngen), jnp.float32,
                                 -scale2, scale2).astype(jnp.bfloat16),
        "b3": jax.random.uniform(ks[5], (1, z * ngen), jnp.float32,
                                 -scale2, scale2),
        # Linear biases b1/b2 exist in the module but are exactly cancelled by
        # training-mode BatchNorm's mean subtraction, so the kernel omits them.
        "b1": jax.random.uniform(ks[1], (1, HIDDEN), jnp.float32, -scale1, scale1),
        "b2": jax.random.uniform(ks[3], (1, HIDDEN), jnp.float32, -scale2, scale2),
        # BatchNorm affine params (default init: gamma=1, beta=0), kept in f32.
        "g1": jnp.ones((1, HIDDEN), jnp.float32),
        "bb1": jnp.zeros((1, HIDDEN), jnp.float32),
        "g2": jnp.ones((1, HIDDEN), jnp.float32),
        "bb2": jnp.zeros((1, HIDDEN), jnp.float32),
    }
    return params


if __name__ == "__main__":
    # Small config implied by the module: args.s, args.z, args.ngen, args.bias.
    S, Z, NGEN, B = 32, 16, 8, 16

    root = jax.random.PRNGKey(0)
    k_x, k_p, k_n = jax.random.split(root, 3)

    x = jax.random.normal(k_x, (B, S), dtype=jnp.float32)
    params = init_params(k_p, S, Z, NGEN)

    w = mixer_forward(x, k_n, params, s=S, z=Z, ngen=NGEN)
    jax.block_until_ready(w)
    assert w.shape == (NGEN, B, Z), w.shape
    assert bool(jnp.all(jnp.isfinite(w)))
    print("KERNEL_OK")
</pallas_src>

<mosaic_0001>
module attributes {stable_mosaic.version = 11 : i64} {
  func.func @mixer_kernel(%arg0: memref<16x32xf32, #tpu.memory_space<vmem>>, %arg1: memref<32x512xbf16, #tpu.memory_space<vmem>>, %arg2: memref<512x512xbf16, #tpu.memory_space<vmem>>, %arg3: memref<512x128xbf16, #tpu.memory_space<vmem>>, %arg4: memref<4x512xf32, #tpu.memory_space<vmem>>, %arg5: memref<1x128xf32, #tpu.memory_space<vmem>>, %arg6: memref<16x128xf32, #tpu.memory_space<vmem>>) attributes {dimension_semantics = [], scalar_prefetch = 0 : i64, scratch_operands = 0 : i64, tpu.core_type = #tpu.core_type<tc>} {
    %c0 = arith.constant 0 : index
    %c0_0 = arith.constant 0 : index
    %0 = vector.load %arg0[%c0, %c0_0] : memref<16x32xf32, #tpu.memory_space<vmem>>, vector<16x32xf32>
    %1 = arith.truncf %0 : vector<16x32xf32> to vector<16x32xbf16>
    %c0_1 = arith.constant 0 : index
    %c0_2 = arith.constant 0 : index
    %2 = vector.load %arg1[%c0_1, %c0_2] : memref<32x512xbf16, #tpu.memory_space<vmem>>, vector<32x512xbf16>
    %cst = arith.constant dense<0.000000e+00> : vector<16x512xf32>
    %3 = tpu.matmul %1, %2, %cst {dimension_numbers = #tpu.dot_dimension_numbers<[1], [0], [0], [1], [0, 0, 1, 1], [], []>} : vector<16x32xbf16>, vector<32x512xbf16>, vector<16x512xf32> -> vector<16x512xf32>
    %c0_3 = arith.constant 0 : index
    %c0_4 = arith.constant 0 : index
    %4 = vector.load %arg4[%c0_3, %c0_4] : memref<4x512xf32, #tpu.memory_space<vmem>>, vector<1x512xf32>
    %c1 = arith.constant 1 : index
    %c0_5 = arith.constant 0 : index
    %5 = vector.load %arg4[%c1, %c0_5] : memref<4x512xf32, #tpu.memory_space<vmem>>, vector<1x512xf32>
    %cst_6 = arith.constant dense<0.000000e+00> : vector<512xf32>
    %6 = vector.multi_reduction <add>, %3, %cst_6 [0] : vector<16x512xf32> to vector<512xf32>
    %7 = vector.shape_cast %6 : vector<512xf32> to vector<1x512xf32>
    %cst_7 = arith.constant 1.600000e+01 : f32
    %8 = vector.broadcast %cst_7 : f32 to vector<1x512xf32>
    %9 = arith.divf %7, %8 : vector<1x512xf32>
    %10 = vector.broadcast %9 : vector<1x512xf32> to vector<16x512xf32>
    %11 = arith.subf %3, %10 : vector<16x512xf32>
    %12 = arith.mulf %11, %11 : vector<16x512xf32>
    %cst_8 = arith.constant dense<0.000000e+00> : vector<512xf32>
    %13 = vector.multi_reduction <add>, %12, %cst_8 [0] : vector<16x512xf32> to vector<512xf32>
    %14 = vector.shape_cast %13 : vector<512xf32> to vector<1x512xf32>
    %cst_9 = arith.constant 1.600000e+01 : f32
    %15 = vector.broadcast %cst_9 : f32 to vector<1x512xf32>
    %16 = arith.divf %14, %15 : vector<1x512xf32>
    %cst_10 = arith.constant 9.99999974E-6 : f32
    %17 = vector.broadcast %cst_10 : f32 to vector<1x512xf32>
    %18 = arith.addf %16, %17 : vector<1x512xf32>
    %19 = math.rsqrt %18 : vector<1x512xf32>
    %20 = arith.mulf %4, %19 : vector<1x512xf32>
    %21 = arith.mulf %9, %20 : vector<1x512xf32>
    %22 = arith.subf %5, %21 : vector<1x512xf32>
    %23 = vector.broadcast %20 : vector<1x512xf32> to vector<16x512xf32>
    %24 = arith.mulf %3, %23 : vector<16x512xf32>
    %25 = vector.broadcast %22 : vector<1x512xf32> to vector<16x512xf32>
    %26 = arith.addf %24, %25 : vector<16x512xf32>
    %cst_11 = arith.constant 0.000000e+00 : f32
    %27 = vector.broadcast %cst_11 : f32 to vector<16x512xf32>
    %28 = arith.maximumf %26, %27 : vector<16x512xf32>
    %29 = arith.truncf %28 : vector<16x512xf32> to vector<16x512xbf16>
    %c0_12 = arith.constant 0 : index
    %c0_13 = arith.constant 0 : index
    %30 = vector.load %arg2[%c0_12, %c0_13] : memref<512x512xbf16, #tpu.memory_space<vmem>>, vector<512x512xbf16>
    %cst_14 = arith.constant dense<0.000000e+00> : vector<16x512xf32>
    %31 = tpu.matmul %29, %30, %cst_14 {dimension_numbers = #tpu.dot_dimension_numbers<[1], [0], [0], [1], [0, 0, 1, 1], [], []>} : vector<16x512xbf16>, vector<512x512xbf16>, vector<16x512xf32> -> vector<16x512xf32>
    %c2 = arith.constant 2 : index
    %c0_15 = arith.constant 0 : index
    %32 = vector.load %arg4[%c2, %c0_15] : memref<4x512xf32, #tpu.memory_space<vmem>>, vector<1x512xf32>
    %c3 = arith.constant 3 : index
    %c0_16 = arith.constant 0 : index
    %33 = vector.load %arg4[%c3, %c0_16] : memref<4x512xf32, #tpu.memory_space<vmem>>, vector<1x512xf32>
    %cst_17 = arith.constant dense<0.000000e+00> : vector<512xf32>
    %34 = vector.multi_reduction <add>, %31, %cst_17 [0] : vector<16x512xf32> to vector<512xf32>
    %35 = vector.shape_cast %34 : vector<512xf32> to vector<1x512xf32>
    %cst_18 = arith.constant 1.600000e+01 : f32
    %36 = vector.broadcast %cst_18 : f32 to vector<1x512xf32>
    %37 = arith.divf %35, %36 : vector<1x512xf32>
    %38 = vector.broadcast %37 : vector<1x512xf32> to vector<16x512xf32>
    %39 = arith.subf %31, %38 : vector<16x512xf32>
    %40 = arith.mulf %39, %39 : vector<16x512xf32>
    %cst_19 = arith.constant dense<0.000000e+00> : vector<512xf32>
    %41 = vector.multi_reduction <add>, %40, %cst_19 [0] : vector<16x512xf32> to vector<512xf32>
    %42 = vector.shape_cast %41 : vector<512xf32> to vector<1x512xf32>
    %cst_20 = arith.constant 1.600000e+01 : f32
    %43 = vector.broadcast %cst_20 : f32 to vector<1x512xf32>
    %44 = arith.divf %42, %43 : vector<1x512xf32>
    %cst_21 = arith.constant 9.99999974E-6 : f32
    %45 = vector.broadcast %cst_21 : f32 to vector<1x512xf32>
    %46 = arith.addf %44, %45 : vector<1x512xf32>
    %47 = math.rsqrt %46 : vector<1x512xf32>
    %48 = arith.mulf %32, %47 : vector<1x512xf32>
    %49 = arith.mulf %37, %48 : vector<1x512xf32>
    %50 = arith.subf %33, %49 : vector<1x512xf32>
    %51 = vector.broadcast %48 : vector<1x512xf32> to vector<16x512xf32>
    %52 = arith.mulf %31, %51 : vector<16x512xf32>
    %53 = vector.broadcast %50 : vector<1x512xf32> to vector<16x512xf32>
    %54 = arith.addf %52, %53 : vector<16x512xf32>
    %cst_22 = arith.constant 0.000000e+00 : f32
    %55 = vector.broadcast %cst_22 : f32 to vector<16x512xf32>
    %56 = arith.maximumf %54, %55 : vector<16x512xf32>
    %57 = arith.truncf %56 : vector<16x512xf32> to vector<16x512xbf16>
    %c0_23 = arith.constant 0 : index
    %c0_24 = arith.constant 0 : index
    %58 = vector.load %arg3[%c0_23, %c0_24] : memref<512x128xbf16, #tpu.memory_space<vmem>>, vector<512x128xbf16>
    %cst_25 = arith.constant dense<0.000000e+00> : vector<16x128xf32>
    %59 = tpu.matmul %57, %58, %cst_25 {dimension_numbers = #tpu.dot_dimension_numbers<[1], [0], [0], [1], [0, 0, 1, 1], [], []>} : vector<16x512xbf16>, vector<512x128xbf16>, vector<16x128xf32> -> vector<16x128xf32>
    %c0_26 = arith.constant 0 : index
    %c0_27 = arith.constant 0 : index
    %60 = vector.load %arg5[%c0_26, %c0_27] : memref<1x128xf32, #tpu.memory_space<vmem>>, vector<1x128xf32>
    %61 = vector.broadcast %60 : vector<1x128xf32> to vector<16x128xf32>
    %62 = arith.addf %59, %61 : vector<16x128xf32>
    %c0_28 = arith.constant 0 : index
    %c0_29 = arith.constant 0 : index
    %63 = vector.load %arg6[%c0_28, %c0_29] : memref<16x128xf32, #tpu.memory_space<vmem>>, vector<16x128xf32>
    tpu.vector_store %arg6[%c0_28, %c0_29], %62 {strides = array<i32>} : memref<16x128xf32, #tpu.memory_space<vmem>>, vector<16x128xf32>,
    return
  }
}

</mosaic_0001>

<bundles_post_ra>
// kernel: mixer_forward.1
= control target key start
LH: loop header
LB: loop body
LE: loop exit
PB: predicated region body
PF: predicated region fallthrough
CT: control target
= control target key end

     0   :  { %11 = vsyncpa [#allocation3], 0  ;;  %s2752_s0 = inlined_call_operand.vmem [shape: f32[16,32], index: 0, kind: input, shape index: {}]   ;;  %s2753_s1 = inlined_call_operand.vmem [shape: bf16[32,512], index: 1, kind: input, shape index: {}]   ;;  %s2754_s2 = inlined_call_operand.hbm [shape: bf16[512,512], index: 2, kind: input, shape index: {}]   ;;  %s2755_s3 = inlined_call_operand.hbm [shape: bf16[512,128], index: 3, kind: input, shape index: {}]   ;;  %s2756_s4 = inlined_call_operand.vmem [shape: f32[4,512], index: 4, kind: input, shape index: {}]   ;;  %s2757_s5 = inlined_call_operand.vmem [shape: f32[1,128], index: 5, kind: input, shape index: {}]   ;;  %s2758_s6 = inlined_call_operand.vmem [shape: f32[16,128], index: 6, kind: output, shape index: {}]  }
   0x1   :  { %12 = vsyncpa [#allocation5], 0  ;;  %s2472_s21 = smov [#allocation2]   ;;  %s2424_s25 = scalar_lea.hbm %s2754_s2, 16384 }
   0x2   :  { %s22_s22 = sshll.u32 %s2472_s21, 4  ;;  %p2425_p0 = scmp.ne.s32.totalorder %s2754_s2, %s2424_s25  ;;  %s23_s22 = int_to_ptr.vmem [resolvable:$true] %s22_s22 }
   0x3   :  { %p2428_p1 = scmp.lt.u32.totalorder %s2424_s25, %s2754_s2 }
   0x5   :  { %p2430_p2 = pnand %p2428_p1, %p2425_p0 }
   0x7   :  { %2433 = shalt.err (!%p2430_p2)
}
   0x8   :  { %s2434_s30 = scalar_lea.vmem %s23_s22, 16384  ;;  %p2439_p4 = scmp.lt.s32.totalorder %s23_s22, %s23_s22 }
   0x9   :  { %p2435_p3 = scmp.ne.s32.totalorder %s23_s22, %s2434_s30  ;;  %p2440_p5 = scmp.lt.s32.totalorder %s2434_s30, %s2434_s30 }
   0xb   :  { %p2441_p6 = por %p2440_p5, %p2439_p4 }
   0xd   :  { %p2442_p7 = pnand %p2441_p6, %p2435_p3 }
   0xf   :  { %2445 = shalt.err (!%p2442_p7)
}
  0x10   :  { %s2473_s7 = smov 256   ;;  %s2474_s8 = smov 16  }
  0x11   :  { %28 = dma.hbm_to_vmem [thread:$0]  %s2754_s2, 16384, %s23_s22, [#allocation3], %s2473_s7, %s2473_s7, %s2474_s8  }
  0x12   :  { %s2475_s11 = smov [#allocation4]   ;;  %s2446_s15 = scalar_lea.hbm %s2755_s3, 4096 }
  0x13   :  { %s34_s12 = sshll.u32 %s2475_s11, 4  ;;  %p2447_p8 = scmp.ne.s32.totalorder %s2755_s3, %s2446_s15  ;;  %s35_s12 = int_to_ptr.vmem [resolvable:$true] %s34_s12 }
  0x14   :  { %p2450_p9 = scmp.lt.u32.totalorder %s2446_s15, %s2755_s3 }
  0x16   :  { %p2452_p10 = pnand %p2450_p9, %p2447_p8 }
  0x18   :  { %2455 = shalt.err (!%p2452_p10)
}
  0x19   :  { %s2456_s20 = scalar_lea.vmem %s35_s12, 4096  ;;  %p2461_p12 = scmp.lt.s32.totalorder %s35_s12, %s35_s12 }
  0x1a   :  { %p2457_p11 = scmp.ne.s32.totalorder %s35_s12, %s2456_s20  ;;  %p2462_p13 = scmp.lt.s32.totalorder %s2456_s20, %s2456_s20 }
  0x1c   :  { %p2463_p0 = por %p2462_p13, %p2461_p12 }
  0x1e   :  { %p2464_p1 = pnand %p2463_p0, %p2457_p11 }
  0x20   :  { %2467 = shalt.err (!%p2464_p1)
}
  0x21   :  { %s2476_s2 = smov 64   ;;  %s2477_s21 = smov 4  }
  0x22   :  { %40 = dma.hbm_to_vmem [thread:$0]  %s2755_s3, 4096, %s35_s12, [#allocation5], %s2476_s2, %s2476_s2, %s2477_s21  }
  0x23   :  { %2468 = dma.done.wait [#allocation3], 16384  }
  0x24   :  { %2469 = vsyncadd [#allocation3], 4294950912 }
  0x25   :  { %2470 = dma.done.wait [#allocation5], 4096  }
  0x26   :  { %2471 = vsyncadd [#allocation5], 4294963200  ;;  %v2478_v0 = vmov 0   ;;  %v2172_v1 = vld [vmem:[%s2753_s1 + $0x4] ss:$16 sps:$4 sm:$0xff]   ;;  %v53_v10 = vld [vmem:[%s2752_s0 + $0x8] sm:$0xff] }
  0x27   :  { %139 = vmatprep.mubr.bf16.mxu0 %v2478_v0  ;;  %182 = vmatprep.mubr.bf16.mxu1 %v2478_v0  ;;  %v2174_v2 = vld [vmem:[%s2753_s1 + $0xc] ss:$16 sps:$4 sm:$0xff]   ;;  %v2176_v3 = vld [vmem:[%s2753_s1] ss:$16 sps:$4 sm:$0xff]   ;;  %v2177_v4 = vld [vmem:[%s2753_s1 + $0x8] ss:$16 sps:$4 sm:$0xff]  }
  0x28   :  { %107 = vmatprep.subr.bf16.mxu0 %v2172_v1  ;;  %150 = vmatprep.subr.bf16.mxu1 %v2174_v2  ;;  %v2178_v5 = vld [vmem:[%s2753_s1 + $0x24] ss:$16 sps:$4 sm:$0xff]   ;;  %v2180_v6 = vld [vmem:[%s2753_s1 + $0x2c] ss:$16 sps:$4 sm:$0xff]   ;;  %v2182_v7 = vld [vmem:[%s2753_s1 + $0x20] ss:$16 sps:$4 sm:$0xff]  }
  0x29   :  { %108 = vmatpush1.bf16.msra.mxu0 %v2176_v3  ;;  %151 = vmatpush1.bf16.msra.mxu1 %v2177_v4  ;;  %v2183_v8 = vld [vmem:[%s2753_s1 + $0x28] ss:$16 sps:$4 sm:$0xff]   ;;  %v52_v9 = vld [vmem:[%s2752_s0] sm:$0xff]  ;;  %vm103_vm0 = vcmask 261120   ;;  %v2189_v13 = vld [vmem:[#allocation2 + $0xc] ss:$16 sps:$4 sm:$0xff]  }
  0x2a   :  { %109 = vmatprep.subr.bf16.mxu0 %v2178_v5  ;;  %152 = vmatprep.subr.bf16.mxu1 %v2180_v6  ;;  %v54_v11 = vpack.c.bf16 %v53_v10, %v52_v9  ;;  %v2186_v12 = vld [vmem:[#allocation2 + $0x4] ss:$16 sps:$4 sm:$0xff]   ;;  %v2184_v14 = vld [vmem:[#allocation2] ss:$16 sps:$4 sm:$0xff]   ;;  %v2187_v15 = vld [vmem:[#allocation2 + $0x8] ss:$16 sps:$4 sm:$0xff]  }
  0x2b   :  { %v2192_v16 = vld [vmem:[#allocation2 + $0x24] ss:$16 sps:$4 sm:$0xff]   ;;  %v2195_v17 = vld [vmem:[#allocation2 + $0x2c] ss:$16 sps:$4 sm:$0xff]   ;;  %v2190_v18 = vld [vmem:[#allocation2 + $0x20] ss:$16 sps:$4 sm:$0xff]  }
  0x2c   :  { %v2193_v19 = vld [vmem:[#allocation2 + $0x28] ss:$16 sps:$4 sm:$0xff]   ;;  %v2198_v20 = vld [vmem:[#allocation2 + $0x44] ss:$16 sps:$4 sm:$0xff]   ;;  %v2201_v21 = vld [vmem:[#allocation2 + $0x4c] ss:$16 sps:$4 sm:$0xff]  }
  0x2d   :  { %110 = vmatpush1.bf16.msra.mxu0 %v2182_v7  ;;  %153 = vmatpush1.bf16.msra.mxu1 %v2183_v8  ;;  %v2196_v22 = vld [vmem:[#allocation2 + $0x40] ss:$16 sps:$4 sm:$0xff]   ;;  %v2199_v23 = vld [vmem:[#allocation2 + $0x48] ss:$16 sps:$4 sm:$0xff]   ;;  %v2204_v24 = vld [vmem:[#allocation2 + $0x64] ss:$16 sps:$4 sm:$0xff]  }
  0x2e   :  { %1187 = vmatprep.subr.bf16.mxu0 %v2186_v12  ;;  %1273 = vmatprep.subr.bf16.mxu1 %v2189_v13  ;;  %v2207_v25 = vld [vmem:[#allocation2 + $0x6c] ss:$16 sps:$4 sm:$0xff]   ;;  %v2202_v26 = vld [vmem:[#allocation2 + $0x60] ss:$16 sps:$4 sm:$0xff]   ;;  %v2205_v27 = vld [vmem:[#allocation2 + $0x68] ss:$16 sps:$4 sm:$0xff]  }
  0x2f   :  { %v2210_v28 = vld [vmem:[#allocation2 + $0x84] ss:$16 sps:$4 sm:$0xff]   ;;  %v2213_v29 = vld [vmem:[#allocation2 + $0x8c] ss:$16 sps:$4 sm:$0xff]   ;;  %v2208_v30 = vld [vmem:[#allocation2 + $0x80] ss:$16 sps:$4 sm:$0xff]  }
  0x30   :  { %1946 = vmatmul.mubr.msk.bf16.vlgmr.msra.gmra.mrb[0].mxu0 %vm103_vm0, %v54_v11  ;;  %1947 = vmatmul.mubr.msk.bf16.vlgmr.msra.gmra.mrb[0].mxu1 %vm103_vm0, %v54_v11  ;;  %v2211_v31 = vld [vmem:[#allocation2 + $0x88] ss:$16 sps:$4 sm:$0xff]   ;;  %v2216_v32 = vld [vmem:[#allocation2 + $0xa4] ss:$16 sps:$4 sm:$0xff]   ;;  %v2219_v33 = vld [vmem:[#allocation2 + $0xac] ss:$16 sps:$4 sm:$0xff]  }
  0x31   :  { %1188 = vmatpush1.bf16.msra.mxu0 %v2184_v14  ;;  %1274 = vmatpush1.bf16.msra.mxu1 %v2187_v15  ;;  %v2214_v34 = vld [vmem:[#allocation2 + $0xa0] ss:$16 sps:$4 sm:$0xff]   ;;  %v2217_v35 = vld [vmem:[#allocation2 + $0xa8] ss:$16 sps:$4 sm:$0xff]   ;;  %v2222_v36 = vld [vmem:[#allocation2 + $0xc4] ss:$16 sps:$4 sm:$0xff]  }
  0x32   :  { %1189 = vmatprep.subr.bf16.mxu0 %v2192_v16  ;;  %1275 = vmatprep.subr.bf16.mxu1 %v2195_v17  ;;  %v2225_v37 = vld [vmem:[#allocation2 + $0xcc] ss:$16 sps:$4 sm:$0xff]   ;;  %v2220_v38 = vld [vmem:[#allocation2 + $0xc0] ss:$16 sps:$4 sm:$0xff]   ;;  %v2223_v39 = vld [vmem:[#allocation2 + $0xc8] ss:$16 sps:$4 sm:$0xff]  }
  0x33   :  { %v2228_v40 = vld [vmem:[#allocation2 + $0xe4] ss:$16 sps:$4 sm:$0xff]   ;;  %v2231_v41 = vld [vmem:[#allocation2 + $0xec] ss:$16 sps:$4 sm:$0xff]   ;;  %v2226_v42 = vld [vmem:[#allocation2 + $0xe0] ss:$16 sps:$4 sm:$0xff]  }
  0x34   :  { %v2229_v43 = vld [vmem:[#allocation2 + $0xe8] ss:$16 sps:$4 sm:$0xff]   ;;  %v2234_v44 = vld [vmem:[#allocation2 + $0x104] ss:$16 sps:$4 sm:$0xff]   ;;  %v2237_v45 = vld [vmem:[#allocation2 + $0x10c] ss:$16 sps:$4 sm:$0xff]  }
  0x35   :  { %1190 = vmatpush1.bf16.msra.mxu0 %v2190_v18  ;;  %1276 = vmatpush1.bf16.msra.mxu1 %v2193_v19  ;;  %v2232_v46 = vld [vmem:[#allocation2 + $0x100] ss:$16 sps:$4 sm:$0xff]   ;;  %v2235_v47 = vld [vmem:[#allocation2 + $0x108] ss:$16 sps:$4 sm:$0xff]   ;;  %v2240_v48 = vld [vmem:[#allocation2 + $0x124] ss:$16 sps:$4 sm:$0xff]  }
  0x36   :  { %1191 = vmatprep.subr.bf16.mxu0 %v2198_v20  ;;  %1277 = vmatprep.subr.bf16.mxu1 %v2201_v21  ;;  %v2243_v49 = vld [vmem:[#allocation2 + $0x12c] ss:$16 sps:$4 sm:$0xff]   ;;  %v2238_v50 = vld [vmem:[#allocation2 + $0x120] ss:$16 sps:$4 sm:$0xff]   ;;  %v2241_v51 = vld [vmem:[#allocation2 + $0x128] ss:$16 sps:$4 sm:$0xff]  }
  0x37   :  { %v2246_v52 = vld [vmem:[#allocation2 + $0x144] ss:$16 sps:$4 sm:$0xff]   ;;  %v2249_v53 = vld [vmem:[#allocation2 + $0x14c] ss:$16 sps:$4 sm:$0xff]   ;;  %v2244_v54 = vld [vmem:[#allocation2 + $0x140] ss:$16 sps:$4 sm:$0xff]  }
  0x38   :  { %v2247_v55 = vld [vmem:[#allocation2 + $0x148] ss:$16 sps:$4 sm:$0xff]   ;;  %v2252_v56 = vld [vmem:[#allocation2 + $0x164] ss:$16 sps:$4 sm:$0xff]   ;;  %v2255_v57 = vld [vmem:[#allocation2 + $0x16c] ss:$16 sps:$4 sm:$0xff]  }
  0x39   :  { %1192 = vmatpush1.bf16.msra.mxu0 %v2196_v22  ;;  %1278 = vmatpush1.bf16.msra.mxu1 %v2199_v23  ;;  %v2250_v58 = vld [vmem:[#allocation2 + $0x160] ss:$16 sps:$4 sm:$0xff]   ;;  %v2253_v59 = vld [vmem:[#allocation2 + $0x168] ss:$16 sps:$4 sm:$0xff]   ;;  %v2258_v60 = vld [vmem:[#allocation2 + $0x184] ss:$16 sps:$4 sm:$0xff]  }
  0x3a   :  { %1193 = vmatprep.subr.bf16.mxu0 %v2204_v24  ;;  %1279 = vmatprep.subr.bf16.mxu1 %v2207_v25  ;;  %v2261_v61 = vld [vmem:[#allocation2 + $0x18c] ss:$16 sps:$4 sm:$0xff]   ;;  %v2256_v62 = vld [vmem:[#allocation2 + $0x180] ss:$16 sps:$4 sm:$0xff]   ;;  %v2259_v63 = vld [vmem:[#allocation2 + $0x188] ss:$16 sps:$4 sm:$0xff]  }
  0x3b   :  { %v2264_v0 = vld [vmem:[#allocation2 + $0x1a4] ss:$16 sps:$4 sm:$0xff]   ;;  %v2267_v1 = vld [vmem:[#allocation2 + $0x1ac] ss:$16 sps:$4 sm:$0xff]   ;;  %v2262_v2 = vld [vmem:[#allocation2 + $0x1a0] ss:$16 sps:$4 sm:$0xff]  }
  0x3c   :  { %v2265_v3 = vld [vmem:[#allocation2 + $0x1a8] ss:$16 sps:$4 sm:$0xff]   ;;  %v2270_v4 = vld [vmem:[#allocation2 + $0x1c4] ss:$16 sps:$4 sm:$0xff]   ;;  %v2273_v5 = vld [vmem:[#allocation2 + $0x1cc] ss:$16 sps:$4 sm:$0xff]  }
  0x3d   :  { %1194 = vmatpush1.bf16.msra.mxu0 %v2202_v26  ;;  %1280 = vmatpush1.bf16.msra.mxu1 %v2205_v27  ;;  %v2268_v6 = vld [vmem:[#allocation2 + $0x1c0] ss:$16 sps:$4 sm:$0xff]   ;;  %v2271_v7 = vld [vmem:[#allocation2 + $0x1c8] ss:$16 sps:$4 sm:$0xff]   ;;  %v2276_v8 = vld [vmem:[#allocation2 + $0x1e4] ss:$16 sps:$4 sm:$0xff]  }
  0x3e   :  { %1195 = vmatprep.subr.bf16.mxu0 %v2210_v28  ;;  %1281 = vmatprep.subr.bf16.mxu1 %v2213_v29  ;;  %v2274_v9 = vld [vmem:[#allocation2 + $0x1e0] ss:$16 sps:$4 sm:$0xff]   ;;  %v2277_v10 = vld [vmem:[#allocation2 + $0x1e8] ss:$16 sps:$4 sm:$0xff]   ;;  %v2279_v11 = vld [vmem:[#allocation2 + $0x1ec] ss:$16 sps:$4 sm:$0xff]  }
  0x3f   :  { %v2282_v12 = vld [vmem:[#allocation2 + $0x204] ss:$16 sps:$4 sm:$0xff]   ;;  %v2285_v13 = vld [vmem:[#allocation2 + $0x20c] ss:$16 sps:$4 sm:$0xff]  }
  0x41   :  { %1196 = vmatpush1.bf16.msra.mxu0 %v2208_v30  ;;  %1282 = vmatpush1.bf16.msra.mxu1 %v2211_v31 }
  0x42   :  { %1197 = vmatprep.subr.bf16.mxu0 %v2216_v32  ;;  %1283 = vmatprep.subr.bf16.mxu1 %v2219_v33 }
  0x45   :  { %1198 = vmatpush1.bf16.msra.mxu0 %v2214_v34  ;;  %1284 = vmatpush1.bf16.msra.mxu1 %v2217_v35 }
  0x46   :  { %1199 = vmatprep.subr.bf16.mxu0 %v2222_v36  ;;  %1285 = vmatprep.subr.bf16.mxu1 %v2225_v37 }
  0x49   :  { %1200 = vmatpush1.bf16.msra.mxu0 %v2220_v38  ;;  %1286 = vmatpush1.bf16.msra.mxu1 %v2223_v39 }
  0x4a   :  { %1201 = vmatprep.subr.bf16.mxu0 %v2228_v40  ;;  %1287 = vmatprep.subr.bf16.mxu1 %v2231_v41 }
  0x4d   :  { %1202 = vmatpush1.bf16.msra.mxu0 %v2226_v42  ;;  %1288 = vmatpush1.bf16.msra.mxu1 %v2229_v43 }
  0x4e   :  { %1203 = vmatprep.subr.bf16.mxu0 %v2234_v44  ;;  %1289 = vmatprep.subr.bf16.mxu1 %v2237_v45 }
  0x51   :  { %1204 = vmatpush1.bf16.msra.mxu0 %v2232_v46  ;;  %1290 = vmatpush1.bf16.msra.mxu1 %v2235_v47 }
  0x52   :  { %1205 = vmatprep.subr.bf16.mxu0 %v2240_v48  ;;  %1291 = vmatprep.subr.bf16.mxu1 %v2243_v49 }
  0x55   :  { %1206 = vmatpush1.bf16.msra.mxu0 %v2238_v50  ;;  %1292 = vmatpush1.bf16.msra.mxu1 %v2241_v51 }
  0x56   :  { %1207 = vmatprep.subr.bf16.mxu0 %v2246_v52  ;;  %1293 = vmatprep.subr.bf16.mxu1 %v2249_v53 }
  0x59   :  { %1208 = vmatpush1.bf16.msra.mxu0 %v2244_v54  ;;  %1294 = vmatpush1.bf16.msra.mxu1 %v2247_v55 }
  0x5a   :  { %1209 = vmatprep.subr.bf16.mxu0 %v2252_v56  ;;  %1295 = vmatprep.subr.bf16.mxu1 %v2255_v57 }
  0x5d   :  { %1210 = vmatpush1.bf16.msra.mxu0 %v2250_v58  ;;  %1296 = vmatpush1.bf16.msra.mxu1 %v2253_v59 }
  0x5e   :  { %1211 = vmatprep.subr.bf16.mxu0 %v2258_v60  ;;  %1297 = vmatprep.subr.bf16.mxu1 %v2261_v61 }
  0x61   :  { %1212 = vmatpush1.bf16.msra.mxu0 %v2256_v62  ;;  %1298 = vmatpush1.bf16.msra.mxu1 %v2259_v63 }
  0x62   :  { %1213 = vmatprep.subr.bf16.mxu0 %v2264_v0  ;;  %1299 = vmatprep.subr.bf16.mxu1 %v2267_v1 }
  0x65   :  { %1214 = vmatpush1.bf16.msra.mxu0 %v2262_v2  ;;  %1300 = vmatpush1.bf16.msra.mxu1 %v2265_v3 }
  0x66   :  { %1215 = vmatprep.subr.bf16.mxu0 %v2270_v4  ;;  %1301 = vmatprep.subr.bf16.mxu1 %v2273_v5 }
  0x69   :  { %1216 = vmatpush1.bf16.msra.mxu0 %v2268_v6  ;;  %1302 = vmatpush1.bf16.msra.mxu1 %v2271_v7 }
  0x6a   :  { %1217 = vmatprep.subr.bf16.mxu0 %v2276_v8  ;;  %1303 = vmatprep.subr.bf16.mxu1 %v2279_v11 }
  0x6d   :  { %1218 = vmatpush1.bf16.msra.mxu0 %v2274_v9  ;;  %1304 = vmatpush1.bf16.msra.mxu1 %v2277_v10 }
  0x6e   :  { %1230 = vmatprep.subr.bf16.mxu0 %v2282_v12  ;;  %1316 = vmatprep.subr.bf16.mxu1 %v2285_v13 }
 0x103   :  { %v2569_v14 = vpop.f32.mrb[0].mxu0  ;;  %v2571_v15 = vpop.f32.mrb[0].mxu1 }
 0x104   :  { %v2573_v16 = vpop.f32.mrb[1].mxu0  ;;  %v2575_v17 = vpop.f32.mrb[1].mxu1 }
 0x105   :  { %v2577_v18 = vpop.f32.mrb[2].mxu0  ;;  %v2579_v19 = vpop.f32.mrb[2].mxu1 }
 0x106   :  { %v196_v20 = vadd.f32 %v2577_v18, %v2569_v14  ;;  %v210_v21 = vadd.f32 %v2579_v19, %v2571_v15  ;;  %v2585_v22 = vpop.f32.mrb[3].mxu0  ;;  %v2587_v23 = vpop.f32.mrb[3].mxu1 }
 0x107   :  { %v203_v24 = vadd.f32 %v2585_v22, %v2573_v16  ;;  %v217_v25 = vadd.f32 %v2587_v23, %v2575_v17 }
 0x108   :  { %v197_v26 = vrot.slane %v196_v20, 4  ;;  %v211_v27 = vrot.slane %v210_v21, 4 }
 0x109   :  { %v204_v28 = vrot.slane %v203_v24, 4  ;;  %v218_v29 = vrot.slane %v217_v25, 4 }
 0x10a   :  { %v198_v30 = vadd.f32 %v197_v26, %v196_v20  ;;  %v212_v31 = vadd.f32 %v211_v27, %v210_v21 }
 0x10b   :  { %v205_v32 = vadd.f32 %v204_v28, %v203_v24  ;;  %v219_v33 = vadd.f32 %v218_v29, %v217_v25 }
 0x10c   :  { %v199_v34 = vrot.slane %v198_v30, 2  ;;  %v213_v35 = vrot.slane %v212_v31, 2 }
 0x10d   :  { %v206_v36 = vrot.slane %v205_v32, 2  ;;  %v220_v37 = vrot.slane %v219_v33, 2 }
 0x10e   :  { %v200_v38 = vadd.f32 %v199_v34, %v198_v30  ;;  %v214_v39 = vadd.f32 %v213_v35, %v212_v31 }
 0x10f   :  { %v207_v40 = vadd.f32 %v206_v36, %v205_v32  ;;  %v221_v41 = vadd.f32 %v220_v37, %v219_v33 }
 0x110   :  { %v201_v42 = vrot.slane %v200_v38, 1  ;;  %v215_v43 = vrot.slane %v214_v39, 1 }
 0x111   :  { %v208_v44 = vrot.slane %v207_v40, 1  ;;  %v222_v45 = vrot.slane %v221_v41, 1 }
 0x112   :  { %v202_v46 = vadd.f32 %v201_v42, %v200_v38  ;;  %v216_v47 = vadd.f32 %v215_v43, %v214_v39 }
 0x113   :  { %v209_v48 = vadd.f32 %v208_v44, %v207_v40  ;;  %v223_v49 = vadd.f32 %v222_v45, %v221_v41 }
 0x114   :  { %v2593_v50 = vmul.f32 0.0625, %v202_v46  ;;  %v2595_v51 = vmul.f32 0.0625, %v216_v47 }
 0x115   :  { %v2597_v52 = vmul.f32 0.0625, %v209_v48  ;;  %v2599_v53 = vmul.f32 0.0625, %v223_v49 }
 0x116   :  { %v229_v54 = vsub.f32 %v2569_v14, %v2593_v50  ;;  %v233_v55 = vsub.f32 %v2577_v18, %v2593_v50  ;;  %v231_v56 = vsub.f32 %v2571_v15, %v2595_v51  ;;  %v235_v57 = vsub.f32 %v2579_v19, %v2595_v51 }
 0x117   :  { %v230_v58 = vsub.f32 %v2573_v16, %v2597_v52  ;;  %v234_v59 = vsub.f32 %v2585_v22, %v2597_v52  ;;  %v232_v60 = vsub.f32 %v2575_v17, %v2599_v53  ;;  %v236_v61 = vsub.f32 %v2587_v23, %v2599_v53 }
 0x118   :  { %v237_v62 = vmul.f32 %v229_v54, %v229_v54  ;;  %v241_v63 = vmul.f32 %v233_v55, %v233_v55  ;;  %v239_v0 = vmul.f32 %v231_v56, %v231_v56  ;;  %v243_v1 = vmul.f32 %v235_v57, %v235_v57 }
 0x119   :  { %v238_v2 = vmul.f32 %v230_v58, %v230_v58  ;;  %v242_v3 = vmul.f32 %v234_v59, %v234_v59  ;;  %v240_v4 = vmul.f32 %v232_v60, %v232_v60  ;;  %v244_v5 = vmul.f32 %v236_v61, %v236_v61 }
 0x11a   :  { %v245_v6 = vadd.f32 %v241_v63, %v237_v62  ;;  %v259_v7 = vadd.f32 %v243_v1, %v239_v0  ;;  %v2479_v54 = vmov 1966171168   ;;  %v294_v56 = vlaneseq }
 0x11b   :  { %v252_v8 = vadd.f32 %v242_v3, %v238_v2  ;;  %v266_v9 = vadd.f32 %v244_v5, %v240_v4  ;;  %v292_v55 = vunpack.c.l.s4 %v2479_v54  ;;  %v193_v5 = vld [vmem:[%s2756_s4] ss:$4 sm:$0xf] }
 0x11c   :  { %v246_v10 = vrot.slane %v245_v6, 4  ;;  %v260_v11 = vrot.slane %v259_v7, 4  ;;  %v295_v58 = vshrl.u32 %v294_v56, 7 }
 0x11d   :  { %v253_v12 = vrot.slane %v252_v8, 4  ;;  %v267_v13 = vrot.slane %v266_v9, 4  ;;  %v293_v57 = vunpack.c.0.s8 %v292_v55 }
 0x11e   :  { %v247_v20 = vadd.f32 %v246_v10, %v245_v6  ;;  %v261_v21 = vadd.f32 %v260_v11, %v259_v7  ;;  %v2624_v6 = vsub.s32 0, %v295_v58  ;;  %v2631_v10 = vsub.s32 3, %v295_v58 }
 0x11f   :  { %v254_v24 = vadd.f32 %v253_v12, %v252_v8  ;;  %v268_v25 = vadd.f32 %v267_v13, %v266_v9  ;;  %v2617_v61 = vsub.s32 %v293_v57, %v295_v58  ;;  %v2627_v8 = vsub.s32 1, %v295_v58  ;;  %v2280_v57 = vld [vmem:[#allocation2 + $0x200] ss:$16 sps:$4 sm:$0xff]  }
 0x120   :  { %v248_v26 = vrot.slane %v247_v20, 2  ;;  %v262_v27 = vrot.slane %v261_v21, 2  ;;  %v2629_v9 = vsub.s32 2, %v295_v58  ;;  %v2283_v58 = vld [vmem:[#allocation2 + $0x208] ss:$16 sps:$4 sm:$0xff]  }
 0x121   :  { %v255_v28 = vrot.slane %v254_v24, 2  ;;  %v269_v29 = vrot.slane %v268_v25, 2 }
 0x122   :  { %v249_v30 = vadd.f32 %v248_v26, %v247_v20  ;;  %v263_v31 = vadd.f32 %v262_v27, %v261_v21 }
 0x123   :  { %v256_v32 = vadd.f32 %v255_v28, %v254_v24  ;;  %v270_v33 = vadd.f32 %v269_v29, %v268_v25 }
 0x124   :  { %v250_v34 = vrot.slane %v249_v30, 1  ;;  %v264_v35 = vrot.slane %v263_v31, 1 }
 0x125   :  { %v257_v36 = vrot.slane %v256_v32, 1  ;;  %v271_v37 = vrot.slane %v270_v33, 1 }
 0x126   :  { %v251_v38 = vadd.f32 %v250_v34, %v249_v30  ;;  %v265_v39 = vadd.f32 %v264_v35, %v263_v31 }
 0x127   :  { %v258_v40 = vadd.f32 %v257_v36, %v256_v32  ;;  %v272_v41 = vadd.f32 %v271_v37, %v270_v33 }
 0x128   :  { %v273_v42 = vmul.f32 0.0625, %v251_v38  ;;  %v275_v43 = vmul.f32 0.0625, %v265_v39 }
 0x129   :  { %v274_v44 = vmul.f32 0.0625, %v258_v40  ;;  %v276_v45 = vmul.f32 0.0625, %v272_v41 }
 0x12a   :  { %v277_v46 = vadd.f32 1e-05, %v273_v42  ;;  %v279_v47 = vadd.f32 1e-05, %v275_v43 }
 0x12b   :  { %v278_v48 = vadd.f32 1e-05, %v274_v44  ;;  %v280_v49 = vadd.f32 1e-05, %v276_v45 }
 0x12c   :  { %2408 = vrsqrt.f32 %v277_v46 }
 0x12d   :  { %2410 = vrsqrt.f32 %v279_v47 }
 0x12e   :  { %2412 = vrsqrt.f32 %v278_v48 }
 0x12f   :  { %2414 = vrsqrt.f32 %v280_v49 }
 0x136   :  { %v2409_v59 = vpop.eup %2408 }
 0x137   :  { %v2411_v60 = vpop.eup %2410 }
 0x138   :  { %v2413_v62 = vpop.eup %2412 }
 0x139   :  { %v2415_v63 = vpop.eup %2414  ;;  %v289_v0 = vcombine.low %v2409_v59, %v2413_v62 }
 0x13a   :  { %v290_v1 = vcombine.low %v2411_v60, %v2415_v63  ;;  %v2288_v63 = vld [vmem:[#allocation2 + $0x224] ss:$16 sps:$4 sm:$0xff]  }
 0x13b   :  { %v297_v2 = vrot.slane %v289_v0, %v2617_v61  ;;  %v2291_v0 = vld [vmem:[#allocation2 + $0x22c] ss:$16 sps:$4 sm:$0xff]  }
 0x13c   :  { %v304_v3 = vrot.slane %v290_v1, %v2617_v61  ;;  %v2286_v1 = vld [vmem:[#allocation2 + $0x220] ss:$16 sps:$4 sm:$0xff]  }
 0x13e   :  { %v305_v4 = vcombine.low %v297_v2, %v304_v3  ;;  %v2289_v2 = vld [vmem:[#allocation2 + $0x228] ss:$16 sps:$4 sm:$0xff]   ;;  %v2294_v3 = vld [vmem:[#allocation2 + $0x244] ss:$16 sps:$4 sm:$0xff]  }
 0x140   :  { %v312_v7 = vrot.slane %v305_v4, %v2617_v61  ;;  %v2297_v4 = vld [vmem:[#allocation2 + $0x24c] ss:$16 sps:$4 sm:$0xff]  }
 0x142   :  { %v314_v11 = vmul.f32 %v312_v7, %v193_v5  ;;  %v2292_v5 = vld [vmem:[#allocation2 + $0x240] ss:$16 sps:$4 sm:$0xff]   ;;  %v2295_v7 = vld [vmem:[#allocation2 + $0x248] ss:$16 sps:$4 sm:$0xff]  }
 0x144   :  { %v319_v12 = vrot.slane %v314_v11, %v2624_v6  ;;  %v323_v13 = vrot.slane %v314_v11, %v2627_v8  ;;  %v327_v20 = vrot.slane %v314_v11, %v2629_v9  ;;  %v331_v21 = vrot.slane %v314_v11, %v2631_v10  ;;  %v2300_v11 = vld [vmem:[#allocation2 + $0x264] ss:$16 sps:$4 sm:$0xff]  }
 0x146   :  { %v336_v24 = vmul.f32 %v319_v12, %v2593_v50  ;;  %v337_v25 = vmul.f32 %v323_v13, %v2597_v52  ;;  %v338_v26 = vmul.f32 %v327_v20, %v2595_v51  ;;  %v339_v27 = vmul.f32 %v331_v21, %v2599_v53 }
 0x147   :  { %v377_v28 = vmul.f32 %v331_v21, %v2587_v23  ;;  %v371_v29 = vmul.f32 %v323_v13, %v2573_v16  ;;  %v375_v30 = vmul.f32 %v323_v13, %v2585_v22  ;;  %v370_v31 = vmul.f32 %v319_v12, %v2569_v14  ;;  %v1948_v16 = vld [vmem:[%s2756_s4 + $0x1] ss:$4 sm:$0xf] }
 0x148   :  { %v344_v32 = vcombine.low %v336_v24, %v337_v25  ;;  %v345_v33 = vcombine.low %v338_v26, %v339_v27  ;;  %v374_v34 = vmul.f32 %v319_v12, %v2577_v18  ;;  %v373_v50 = vmul.f32 %v331_v21, %v2575_v17  ;;  %v2303_v12 = vld [vmem:[#allocation2 + $0x26c] ss:$16 sps:$4 sm:$0xff]   ;;  %v2298_v13 = vld [vmem:[#allocation2 + $0x260] ss:$16 sps:$4 sm:$0xff]   ;;  %v2306_v21 = vld [vmem:[#allocation2 + $0x284] ss:$16 sps:$4 sm:$0xff]  }
 0x149   :  { %v372_v52 = vmul.f32 %v327_v20, %v2571_v15  ;;  %v376_v51 = vmul.f32 %v327_v20, %v2579_v19  ;;  %v2301_v20 = vld [vmem:[#allocation2 + $0x268] ss:$16 sps:$4 sm:$0xff]   ;;  %v2309_v24 = vld [vmem:[#allocation2 + $0x28c] ss:$16 sps:$4 sm:$0xff]   ;;  %v2304_v25 = vld [vmem:[#allocation2 + $0x280] ss:$16 sps:$4 sm:$0xff]  }
 0x14a   :  { %v352_v53 = vrot.slane %v344_v32, %v2617_v61  ;;  %v359_v23 = vrot.slane %v345_v33, %v2617_v61  ;;  %v2307_v26 = vld [vmem:[#allocation2 + $0x288] ss:$16 sps:$4 sm:$0xff]   ;;  %v2312_v27 = vld [vmem:[#allocation2 + $0x2a4] ss:$16 sps:$4 sm:$0xff]   ;;  %v2321_v32 = vld [vmem:[#allocation2 + $0x2cc] ss:$16 sps:$4 sm:$0xff]  }
 0x14b   :  { %v2316_v33 = vld [vmem:[#allocation2 + $0x2c0] ss:$16 sps:$4 sm:$0xff]  }
 0x14c   :  { %v360_v35 = vcombine.low %v352_v53, %v359_v23  ;;  %v2325_v53 = vld [vmem:[#allocation2 + $0x2e8] ss:$16 sps:$4 sm:$0xff]   ;;  %v2330_v23 = vld [vmem:[#allocation2 + $0x304] ss:$16 sps:$4 sm:$0xff]  }
 0x14e   :  { %v367_v14 = vrot.slane %v360_v35, %v2617_v61  ;;  %v2333_v35 = vld [vmem:[#allocation2 + $0x30c] ss:$16 sps:$4 sm:$0xff]  }
 0x150   :  { %v369_v22 = vsub.f32 %v1948_v16, %v367_v14  ;;  %v2328_v16 = vld [vmem:[#allocation2 + $0x300] ss:$16 sps:$4 sm:$0xff]   ;;  %v2331_v14 = vld [vmem:[#allocation2 + $0x308] ss:$16 sps:$4 sm:$0xff]  }
 0x152   :  { %v394_v18 = vrot.slane %v369_v22, %v2631_v10  ;;  %v386_v17 = vrot.slane %v369_v22, %v2627_v8  ;;  %v382_v15 = vrot.slane %v369_v22, %v2624_v6  ;;  %v390_v19 = vrot.slane %v369_v22, %v2629_v9  ;;  %v2336_v22 = vld [vmem:[#allocation2 + $0x324] ss:$16 sps:$4 sm:$0xff]  }
 0x154   :  { %v406_v36 = vadd.f32 %v394_v18, %v377_v28  ;;  %v400_v37 = vadd.f32 %v386_v17, %v371_v29  ;;  %v404_v38 = vadd.f32 %v386_v17, %v375_v30  ;;  %v399_v39 = vadd.f32 %v382_v15, %v370_v31  ;;  %v2315_v28 = vld [vmem:[#allocation2 + $0x2ac] ss:$16 sps:$4 sm:$0xff]   ;;  %v2310_v29 = vld [vmem:[#allocation2 + $0x2a0] ss:$16 sps:$4 sm:$0xff]   ;;  %v2313_v30 = vld [vmem:[#allocation2 + $0x2a8] ss:$16 sps:$4 sm:$0xff]  }
 0x155   :  { %v403_v40 = vadd.f32 %v382_v15, %v374_v34  ;;  %v402_v41 = vadd.f32 %v394_v18, %v373_v50  ;;  %v401_v42 = vadd.f32 %v390_v19, %v372_v52  ;;  %v405_v43 = vadd.f32 %v390_v19, %v376_v51  ;;  %v2318_v31 = vld [vmem:[#allocation2 + $0x2c4] ss:$16 sps:$4 sm:$0xff]   ;;  %v2319_v34 = vld [vmem:[#allocation2 + $0x2c8] ss:$16 sps:$4 sm:$0xff]   ;;  %v2327_v52 = vld [vmem:[#allocation2 + $0x2ec] ss:$16 sps:$4 sm:$0xff]  }
 0x156   :  { %v408_v44 = vmax.f32 %v400_v37, 0.0  ;;  %v412_v45 = vmax.f32 %v404_v38, 0.0  ;;  %v407_v46 = vmax.f32 %v399_v39, 0.0  ;;  %v414_v47 = vmax.f32 %v406_v36, 0.0  ;;  %v2324_v50 = vld [vmem:[#allocation2 + $0x2e4] ss:$16 sps:$4 sm:$0xff]  }
 0x157   :  { %v411_v48 = vmax.f32 %v403_v40, 0.0  ;;  %v410_v49 = vmax.f32 %v402_v41, 0.0  ;;  %v409_v54 = vmax.f32 %v401_v42, 0.0  ;;  %v413_v55 = vmax.f32 %v405_v43, 0.0  ;;  %v2322_v51 = vld [vmem:[#allocation2 + $0x2e0] ss:$16 sps:$4 sm:$0xff]  }
 0x158   :  { %v416_v56 = vpack.c.bf16 %v412_v45, %v408_v44  ;;  %v2339_v18 = vld [vmem:[#allocation2 + $0x32c] ss:$16 sps:$4 sm:$0xff]   ;;  %v2334_v17 = vld [vmem:[#allocation2 + $0x320] ss:$16 sps:$4 sm:$0xff]   ;;  %v2337_v15 = vld [vmem:[#allocation2 + $0x328] ss:$16 sps:$4 sm:$0xff]  }
 0x159   :  { %v415_v59 = vpack.c.bf16 %v411_v48, %v407_v46  ;;  %v418_v60 = vpack.c.bf16 %v414_v47, %v410_v49  ;;  %v2659_v62 = vpack.c.bf16 %v413_v55, %v409_v54  ;;  %v2342_v19 = vld [vmem:[#allocation2 + $0x344] ss:$16 sps:$4 sm:$0xff]   ;;  %v2345_v36 = vld [vmem:[#allocation2 + $0x34c] ss:$16 sps:$4 sm:$0xff]   ;;  %v2340_v37 = vld [vmem:[#allocation2 + $0x340] ss:$16 sps:$4 sm:$0xff]  }
 0x15a   :  { %1219 = vmatprep.mubr.bf16.mxu0 %v416_v56  ;;  %1305 = vmatprep.mubr.bf16.mxu1 %v416_v56  ;;  %v2343_v38 = vld [vmem:[#allocation2 + $0x348] ss:$16 sps:$4 sm:$0xff]   ;;  %v2348_v39 = vld [vmem:[#allocation2 + $0x364] ss:$16 sps:$4 sm:$0xff]   ;;  %v2351_v40 = vld [vmem:[#allocation2 + $0x36c] ss:$16 sps:$4 sm:$0xff]  }
 0x15b   :  { %1220 = vmatmul.mubr.bf16.vlgmr.msra.gmra.mrb[4].mxu0 %v415_v59  ;;  %1306 = vmatmul.mubr.bf16.vlgmr.msra.gmra.mrb[4].mxu1 %v415_v59  ;;  %v2346_v41 = vld [vmem:[#allocation2 + $0x360] ss:$16 sps:$4 sm:$0xff]   ;;  %v2349_v42 = vld [vmem:[#allocation2 + $0x368] ss:$16 sps:$4 sm:$0xff]   ;;  %v2354_v43 = vld [vmem:[#allocation2 + $0x384] ss:$16 sps:$4 sm:$0xff]  }
 0x15c   :  { %1231 = vmatpush1.bf16.msra.mxu0 %v2280_v57  ;;  %1317 = vmatpush1.bf16.msra.mxu1 %v2283_v58  ;;  %v2357_v44 = vld [vmem:[#allocation2 + $0x38c] ss:$16 sps:$4 sm:$0xff]   ;;  %v2352_v45 = vld [vmem:[#allocation2 + $0x380] ss:$16 sps:$4 sm:$0xff]   ;;  %v2355_v46 = vld [vmem:[#allocation2 + $0x388] ss:$16 sps:$4 sm:$0xff]  }
 0x15d   :  { %1262 = vmatprep.mubr.bf16.mxu0 %v418_v60  ;;  %1348 = vmatprep.mubr.bf16.mxu1 %v418_v60  ;;  %v2360_v47 = vld [vmem:[#allocation2 + $0x3a4] ss:$16 sps:$4 sm:$0xff]   ;;  %v2363_v48 = vld [vmem:[#allocation2 + $0x3ac] ss:$16 sps:$4 sm:$0xff]   ;;  %v2358_v49 = vld [vmem:[#allocation2 + $0x3a0] ss:$16 sps:$4 sm:$0xff]  }
 0x15e   :  { %1232 = vmatprep.subr.bf16.mxu0 %v2288_v63  ;;  %1318 = vmatprep.subr.bf16.mxu1 %v2291_v0  ;;  %v2361_v54 = vld [vmem:[#allocation2 + $0x3a8] ss:$16 sps:$4 sm:$0xff]   ;;  %v2366_v55 = vld [vmem:[#allocation2 + $0x3c4] ss:$16 sps:$4 sm:$0xff]   ;;  %v2369_v56 = vld [vmem:[#allocation2 + $0x3cc] ss:$16 sps:$4 sm:$0xff]  }
 0x15f   :  { %v2364_v57 = vld [vmem:[#allocation2 + $0x3c0] ss:$16 sps:$4 sm:$0xff]   ;;  %v2367_v58 = vld [vmem:[#allocation2 + $0x3c8] ss:$16 sps:$4 sm:$0xff]   ;;  %v2372_v59 = vld [vmem:[#allocation2 + $0x3e4] ss:$16 sps:$4 sm:$0xff]  }
 0x160   :  { %1233 = vmatpush1.bf16.msra.mxu0 %v2286_v1  ;;  %1319 = vmatpush1.bf16.msra.mxu1 %v2289_v2  ;;  %v2375_v60 = vld [vmem:[#allocation2 + $0x3ec] ss:$16 sps:$4 sm:$0xff]   ;;  %v2370_v63 = vld [vmem:[#allocation2 + $0x3e0] ss:$16 sps:$4 sm:$0xff]   ;;  %v2373_v0 = vld [vmem:[#allocation2 + $0x3e8] ss:$16 sps:$4 sm:$0xff]  }
 0x161   :  { %1234 = vmatprep.subr.bf16.mxu0 %v2294_v3  ;;  %1320 = vmatprep.subr.bf16.mxu1 %v2297_v4  ;;  %v2376_v1 = vld [vmem:[#allocation4 + $0x40] sm:$0xff]  }
 0x162   :  { %v2377_v2 = vld [vmem:[#allocation4 + $0xc0] sm:$0xff]  }
 0x163   :  { %v2378_v3 = vld [vmem:[#allocation4] sm:$0xff]  }
 0x164   :  { %1235 = vmatpush1.bf16.msra.mxu0 %v2292_v5  ;;  %1321 = vmatpush1.bf16.msra.mxu1 %v2295_v7  ;;  %v2379_v4 = vld [vmem:[#allocation4 + $0x80] sm:$0xff]   ;;  %v2380_v5 = vld [vmem:[#allocation4 + $0x48] sm:$0xff]  }
 0x165   :  { %1236 = vmatprep.subr.bf16.mxu0 %v2300_v11  ;;  %1322 = vmatprep.subr.bf16.mxu1 %v2303_v12  ;;  %v2381_v7 = vld [vmem:[#allocation4 + $0xc8] sm:$0xff]  }
 0x166   :  { %v2382_v11 = vld [vmem:[#allocation4 + $0x8] sm:$0xff]  }
 0x167   :  { %v2383_v12 = vld [vmem:[#allocation4 + $0x88] sm:$0xff]  }
 0x168   :  { %1237 = vmatpush1.bf16.msra.mxu0 %v2298_v13  ;;  %1323 = vmatpush1.bf16.msra.mxu1 %v2301_v20  ;;  %v2384_v13 = vld [vmem:[#allocation4 + $0x50] sm:$0xff]  }
 0x169   :  { %1238 = vmatprep.subr.bf16.mxu0 %v2306_v21  ;;  %1324 = vmatprep.subr.bf16.mxu1 %v2309_v24  ;;  %v2385_v20 = vld [vmem:[#allocation4 + $0xd0] sm:$0xff]   ;;  %v2388_v24 = vld [vmem:[#allocation4 + $0x58] sm:$0xff]  }
 0x16a   :  { %v2386_v21 = vld [vmem:[#allocation4 + $0x10] sm:$0xff]  }
 0x16c   :  { %1239 = vmatpush1.bf16.msra.mxu0 %v2304_v25  ;;  %1325 = vmatpush1.bf16.msra.mxu1 %v2307_v26  ;;  %v2389_v25 = vld [vmem:[#allocation4 + $0xd8] sm:$0xff]  }
 0x16d   :  { %1240 = vmatprep.subr.bf16.mxu0 %v2312_v27  ;;  %1326 = vmatprep.subr.bf16.mxu1 %v2315_v28  ;;  %v2390_v26 = vld [vmem:[#allocation4 + $0x18] sm:$0xff]   ;;  %v2392_v28 = vld [vmem:[#allocation4 + $0x60] sm:$0xff]  }
 0x16e   :  { %v2391_v27 = vld [vmem:[#allocation4 + $0x98] sm:$0xff]  }
 0x170   :  { %1241 = vmatpush1.bf16.msra.mxu0 %v2310_v29  ;;  %1327 = vmatpush1.bf16.msra.mxu1 %v2313_v30  ;;  %v2393_v29 = vld [vmem:[#allocation4 + $0xe0] sm:$0xff]  }
 0x171   :  { %1242 = vmatprep.subr.bf16.mxu0 %v2318_v31  ;;  %1328 = vmatprep.subr.bf16.mxu1 %v2321_v32  ;;  %v2394_v30 = vld [vmem:[#allocation4 + $0x20] sm:$0xff]   ;;  %v2396_v32 = vld [vmem:[#allocation4 + $0x68] sm:$0xff]  }
 0x172   :  { %v2395_v31 = vld [vmem:[#allocation4 + $0xa0] sm:$0xff]  }
 0x174   :  { %1243 = vmatpush1.bf16.msra.mxu0 %v2316_v33  ;;  %1329 = vmatpush1.bf16.msra.mxu1 %v2319_v34  ;;  %v2397_v33 = vld [vmem:[#allocation4 + $0xe8] sm:$0xff]  }
 0x175   :  { %1244 = vmatprep.subr.bf16.mxu0 %v2324_v50  ;;  %1330 = vmatprep.subr.bf16.mxu1 %v2327_v52  ;;  %v2398_v34 = vld [vmem:[#allocation4 + $0x28] sm:$0xff]   ;;  %v2400_v52 = vld [vmem:[#allocation4 + $0x70] sm:$0xff]  }
 0x176   :  { %v2399_v50 = vld [vmem:[#allocation4 + $0xa8] sm:$0xff]  }
 0x178   :  { %1245 = vmatpush1.bf16.msra.mxu0 %v2322_v51  ;;  %1331 = vmatpush1.bf16.msra.mxu1 %v2325_v53  ;;  %v2401_v51 = vld [vmem:[#allocation4 + $0xf0] sm:$0xff]  }
 0x179   :  { %1246 = vmatprep.subr.bf16.mxu0 %v2330_v23  ;;  %1332 = vmatprep.subr.bf16.mxu1 %v2333_v35  ;;  %v2402_v53 = vld [vmem:[#allocation4 + $0x30] sm:$0xff]   ;;  %v2404_v35 = vld [vmem:[#allocation4 + $0x78] sm:$0xff]  }
 0x17a   :  { %v2403_v23 = vld [vmem:[#allocation4 + $0xb0] sm:$0xff]  }
 0x17c   :  { %1247 = vmatpush1.bf16.msra.mxu0 %v2328_v16  ;;  %1333 = vmatpush1.bf16.msra.mxu1 %v2331_v14  ;;  %v2405_v16 = vld [vmem:[#allocation4 + $0xf8] sm:$0xff]  }
 0x17d   :  { %1248 = vmatprep.subr.bf16.mxu0 %v2336_v22  ;;  %1334 = vmatprep.subr.bf16.mxu1 %v2339_v18  ;;  %v2406_v14 = vld [vmem:[#allocation4 + $0x38] sm:$0xff]  }
 0x17e   :  { %v2407_v22 = vld [vmem:[#allocation4 + $0xb8] sm:$0xff]  }
 0x180   :  { %1249 = vmatpush1.bf16.msra.mxu0 %v2334_v17  ;;  %1335 = vmatpush1.bf16.msra.mxu1 %v2337_v15 }
 0x181   :  { %1250 = vmatprep.subr.bf16.mxu0 %v2342_v19  ;;  %1336 = vmatprep.subr.bf16.mxu1 %v2345_v36 }
 0x184   :  { %1251 = vmatpush1.bf16.msra.mxu0 %v2340_v37  ;;  %1337 = vmatpush1.bf16.msra.mxu1 %v2343_v38 }
 0x185   :  { %1252 = vmatprep.subr.bf16.mxu0 %v2348_v39  ;;  %1338 = vmatprep.subr.bf16.mxu1 %v2351_v40 }
 0x188   :  { %1253 = vmatpush1.bf16.msra.mxu0 %v2346_v41  ;;  %1339 = vmatpush1.bf16.msra.mxu1 %v2349_v42 }
 0x189   :  { %1254 = vmatprep.subr.bf16.mxu0 %v2354_v43  ;;  %1340 = vmatprep.subr.bf16.mxu1 %v2357_v44 }
 0x18c   :  { %1255 = vmatpush1.bf16.msra.mxu0 %v2352_v45  ;;  %1341 = vmatpush1.bf16.msra.mxu1 %v2355_v46 }
 0x18d   :  { %1256 = vmatprep.subr.bf16.mxu0 %v2360_v47  ;;  %1342 = vmatprep.subr.bf16.mxu1 %v2363_v48 }
 0x190   :  { %1257 = vmatpush1.bf16.msra.mxu0 %v2358_v49  ;;  %1343 = vmatpush1.bf16.msra.mxu1 %v2361_v54 }
 0x191   :  { %1258 = vmatprep.subr.bf16.mxu0 %v2366_v55  ;;  %1344 = vmatprep.subr.bf16.mxu1 %v2369_v56 }
 0x194   :  { %1259 = vmatpush1.bf16.msra.mxu0 %v2364_v57  ;;  %1345 = vmatpush1.bf16.msra.mxu1 %v2367_v58 }
 0x195   :  { %1260 = vmatprep.subr.bf16.mxu0 %v2372_v59  ;;  %1346 = vmatprep.subr.bf16.mxu1 %v2375_v60 }
 0x198   :  { %1261 = vmatpush1.bf16.msra.mxu0 %v2370_v63  ;;  %1347 = vmatpush1.bf16.msra.mxu1 %v2373_v0 }
 0x199   :  { %2112 = vmatprep.subr.bf16.mxu0 %v2376_v1  ;;  %2134 = vmatprep.subr.bf16.mxu1 %v2377_v2 }
 0x19b   :  { %1263 = vmatmul.mubr.bf16.vlgmr.msra.gmra.mrb[4].mxu0 %v2659_v62  ;;  %1349 = vmatmul.mubr.bf16.vlgmr.msra.gmra.mrb[4].mxu1 %v2659_v62  ;;  %v2387_v62 = vld [vmem:[#allocation4 + $0x90] sm:$0xff]  }
 0x19c   :  { %2113 = vmatpush3.bf16.msra.mxu0 %v2378_v3  ;;  %2135 = vmatpush3.bf16.msra.mxu1 %v2379_v4 }
 0x19d   :  { %2114 = vmatprep.subr.bf16.mxu0 %v2380_v5  ;;  %2136 = vmatprep.subr.bf16.mxu1 %v2381_v7 }
 0x1a0   :  { %2115 = vmatpush3.bf16.msra.mxu0 %v2382_v11  ;;  %2137 = vmatpush3.bf16.msra.mxu1 %v2383_v12 }
 0x1a1   :  { %2116 = vmatprep.subr.bf16.mxu0 %v2384_v13  ;;  %2138 = vmatprep.subr.bf16.mxu1 %v2385_v20 }
 0x1a4   :  { %2117 = vmatpush3.bf16.msra.mxu0 %v2386_v21  ;;  %2139 = vmatpush3.bf16.msra.mxu1 %v2387_v62 }
 0x1a5   :  { %2118 = vmatprep.subr.bf16.mxu0 %v2388_v24  ;;  %2140 = vmatprep.subr.bf16.mxu1 %v2389_v25 }
 0x1a8   :  { %2119 = vmatpush3.bf16.msra.mxu0 %v2390_v26  ;;  %2141 = vmatpush3.bf16.msra.mxu1 %v2391_v27 }
 0x1a9   :  { %2120 = vmatprep.subr.bf16.mxu0 %v2392_v28  ;;  %2142 = vmatprep.subr.bf16.mxu1 %v2393_v29 }
 0x1ac   :  { %2121 = vmatpush3.bf16.msra.mxu0 %v2394_v30  ;;  %2143 = vmatpush3.bf16.msra.mxu1 %v2395_v31 }
 0x1ad   :  { %2122 = vmatprep.subr.bf16.mxu0 %v2396_v32  ;;  %2144 = vmatprep.subr.bf16.mxu1 %v2397_v33 }
 0x1b0   :  { %2123 = vmatpush3.bf16.msra.mxu0 %v2398_v34  ;;  %2145 = vmatpush3.bf16.msra.mxu1 %v2399_v50 }
 0x1b1   :  { %2124 = vmatprep.subr.bf16.mxu0 %v2400_v52  ;;  %2146 = vmatprep.subr.bf16.mxu1 %v2401_v51 }
 0x1b4   :  { %2125 = vmatpush3.bf16.msra.mxu0 %v2402_v53  ;;  %2147 = vmatpush3.bf16.msra.mxu1 %v2403_v23 }
 0x1b5   :  { %2126 = vmatprep.subr.bf16.mxu0 %v2404_v35  ;;  %2148 = vmatprep.subr.bf16.mxu1 %v2405_v16 }
 0x1b8   :  { %2127 = vmatpush3.bf16.msra.mxu0 %v2406_v14  ;;  %2149 = vmatpush3.bf16.msra.mxu1 %v2407_v22 }
 0x26e   :  { %v2663_v18 = vpop.f32.mrb[4].mxu0  ;;  %v2665_v17 = vpop.f32.mrb[4].mxu1 }
 0x26f   :  { %v2667_v15 = vpop.f32.mrb[5].mxu0  ;;  %v2669_v19 = vpop.f32.mrb[5].mxu1 }
 0x270   :  { %v2671_v36 = vpop.f32.mrb[6].mxu0  ;;  %v2673_v37 = vpop.f32.mrb[6].mxu1 }
 0x271   :  { %v1363_v38 = vadd.f32 %v2671_v36, %v2663_v18  ;;  %v1377_v39 = vadd.f32 %v2673_v37, %v2665_v17  ;;  %v2679_v40 = vpop.f32.mrb[7].mxu0  ;;  %v2681_v41 = vpop.f32.mrb[7].mxu1 }
 0x272   :  { %v1370_v42 = vadd.f32 %v2679_v40, %v2667_v15  ;;  %v1384_v43 = vadd.f32 %v2681_v41, %v2669_v19 }
 0x273   :  { %v1364_v44 = vrot.slane %v1363_v38, 4  ;;  %v1378_v45 = vrot.slane %v1377_v39, 4 }
 0x274   :  { %v1371_v46 = vrot.slane %v1370_v42, 4  ;;  %v1385_v47 = vrot.slane %v1384_v43, 4 }
 0x275   :  { %v1365_v48 = vadd.f32 %v1364_v44, %v1363_v38  ;;  %v1379_v49 = vadd.f32 %v1378_v45, %v1377_v39 }
 0x276   :  { %v1372_v54 = vadd.f32 %v1371_v46, %v1370_v42  ;;  %v1386_v55 = vadd.f32 %v1385_v47, %v1384_v43 }
 0x277   :  { %v1366_v56 = vrot.slane %v1365_v48, 2  ;;  %v1380_v57 = vrot.slane %v1379_v49, 2 }
 0x278   :  { %v1373_v58 = vrot.slane %v1372_v54, 2  ;;  %v1387_v59 = vrot.slane %v1386_v55, 2 }
 0x279   :  { %v1367_v60 = vadd.f32 %v1366_v56, %v1365_v48  ;;  %v1381_v63 = vadd.f32 %v1380_v57, %v1379_v49 }
 0x27a   :  { %v1374_v0 = vadd.f32 %v1373_v58, %v1372_v54  ;;  %v1388_v1 = vadd.f32 %v1387_v59, %v1386_v55 }
 0x27b   :  { %v1368_v2 = vrot.slane %v1367_v60, 1  ;;  %v1382_v3 = vrot.slane %v1381_v63, 1 }
 0x27c   :  { %v1375_v4 = vrot.slane %v1374_v0, 1  ;;  %v1389_v5 = vrot.slane %v1388_v1, 1 }
 0x27d   :  { %v1369_v7 = vadd.f32 %v1368_v2, %v1367_v60  ;;  %v1383_v11 = vadd.f32 %v1382_v3, %v1381_v63 }
 0x27e   :  { %v1376_v12 = vadd.f32 %v1375_v4, %v1374_v0  ;;  %v1390_v13 = vadd.f32 %v1389_v5, %v1388_v1 }
 0x27f   :  { %v2687_v20 = vmul.f32 0.0625, %v1369_v7  ;;  %v2689_v21 = vmul.f32 0.0625, %v1383_v11 }
 0x280   :  { %v2691_v62 = vmul.f32 0.0625, %v1376_v12  ;;  %v2693_v24 = vmul.f32 0.0625, %v1390_v13 }
 0x281   :  { %v1395_v25 = vsub.f32 %v2663_v18, %v2687_v20  ;;  %v1399_v26 = vsub.f32 %v2671_v36, %v2687_v20  ;;  %v1397_v27 = vsub.f32 %v2665_v17, %v2689_v21  ;;  %v1401_v28 = vsub.f32 %v2673_v37, %v2689_v21 }
 0x282   :  { %v1396_v29 = vsub.f32 %v2667_v15, %v2691_v62  ;;  %v1400_v30 = vsub.f32 %v2679_v40, %v2691_v62  ;;  %v1398_v31 = vsub.f32 %v2669_v19, %v2693_v24  ;;  %v1402_v32 = vsub.f32 %v2681_v41, %v2693_v24 }
 0x283   :  { %v1403_v33 = vmul.f32 %v1395_v25, %v1395_v25  ;;  %v1407_v34 = vmul.f32 %v1399_v26, %v1399_v26  ;;  %v1405_v50 = vmul.f32 %v1397_v27, %v1397_v27  ;;  %v1409_v52 = vmul.f32 %v1401_v28, %v1401_v28 }
 0x284   :  { %v1404_v51 = vmul.f32 %v1396_v29, %v1396_v29  ;;  %v1408_v53 = vmul.f32 %v1400_v30, %v1400_v30  ;;  %v1406_v23 = vmul.f32 %v1398_v31, %v1398_v31  ;;  %v1410_v35 = vmul.f32 %v1402_v32, %v1402_v32 }
 0x285   :  { %v1411_v16 = vadd.f32 %v1407_v34, %v1403_v33  ;;  %v1425_v14 = vadd.f32 %v1409_v52, %v1405_v50 }
 0x286   :  { %v1418_v22 = vadd.f32 %v1408_v53, %v1404_v51  ;;  %v1432_v38 = vadd.f32 %v1410_v35, %v1406_v23  ;;  %v2077_v23 = vld [vmem:[%s2756_s4 + $0x2] ss:$4 sm:$0xf] }
 0x287   :  { %v1412_v39 = vrot.slane %v1411_v16, 4  ;;  %v1426_v42 = vrot.slane %v1425_v14, 4 }
 0x288   :  { %v1419_v43 = vrot.slane %v1418_v22, 4  ;;  %v1433_v44 = vrot.slane %v1432_v38, 4 }
 0x289   :  { %v1413_v45 = vadd.f32 %v1412_v39, %v1411_v16  ;;  %v1427_v46 = vadd.f32 %v1426_v42, %v1425_v14 }
 0x28a   :  { %v1420_v47 = vadd.f32 %v1419_v43, %v1418_v22  ;;  %v1434_v48 = vadd.f32 %v1433_v44, %v1432_v38 }
 0x28b   :  { %v1414_v49 = vrot.slane %v1413_v45, 2  ;;  %v1428_v54 = vrot.slane %v1427_v46, 2 }
 0x28c   :  { %v1421_v55 = vrot.slane %v1420_v47, 2  ;;  %v1435_v56 = vrot.slane %v1434_v48, 2 }
 0x28d   :  { %v1415_v57 = vadd.f32 %v1414_v49, %v1413_v45  ;;  %v1429_v58 = vadd.f32 %v1428_v54, %v1427_v46 }
 0x28e   :  { %v1422_v59 = vadd.f32 %v1421_v55, %v1420_v47  ;;  %v1436_v60 = vadd.f32 %v1435_v56, %v1434_v48 }
 0x28f   :  { %v1416_v63 = vrot.slane %v1415_v57, 1  ;;  %v1430_v0 = vrot.slane %v1429_v58, 1 }
 0x290   :  { %v1423_v1 = vrot.slane %v1422_v59, 1  ;;  %v1437_v2 = vrot.slane %v1436_v60, 1 }
 0x291   :  { %v1417_v3 = vadd.f32 %v1416_v63, %v1415_v57  ;;  %v1431_v4 = vadd.f32 %v1430_v0, %v1429_v58 }
 0x292   :  { %v1424_v5 = vadd.f32 %v1423_v1, %v1422_v59  ;;  %v1438_v7 = vadd.f32 %v1437_v2, %v1436_v60 }
 0x293   :  { %v1439_v11 = vmul.f32 0.0625, %v1417_v3  ;;  %v1441_v12 = vmul.f32 0.0625, %v1431_v4 }
 0x294   :  { %v1440_v13 = vmul.f32 0.0625, %v1424_v5  ;;  %v1442_v25 = vmul.f32 0.0625, %v1438_v7 }
 0x295   :  { %v1443_v26 = vadd.f32 1e-05, %v1439_v11  ;;  %v1445_v27 = vadd.f32 1e-05, %v1441_v12 }
 0x296   :  { %v1444_v28 = vadd.f32 1e-05, %v1440_v13  ;;  %v1446_v29 = vadd.f32 1e-05, %v1442_v25 }
 0x297   :  { %2416 = vrsqrt.f32 %v1443_v26 }
 0x298   :  { %2418 = vrsqrt.f32 %v1445_v27 }
 0x299   :  { %2420 = vrsqrt.f32 %v1444_v28  ;;  %v2079_v28 = vld [vmem:[%s2757_s5] ss:$0 sm:$0xff] }
 0x29a   :  { %2422 = vrsqrt.f32 %v1446_v29 }
 0x2a1   :  { %v2417_v30 = vpop.eup %2416 }
 0x2a2   :  { %v2419_v31 = vpop.eup %2418 }
 0x2a3   :  { %v2421_v32 = vpop.eup %2420 }
 0x2a4   :  { %v2423_v33 = vpop.eup %2422  ;;  %v1455_v34 = vcombine.low %v2417_v30, %v2421_v32 }
 0x2a5   :  { %v1456_v50 = vcombine.low %v2419_v31, %v2423_v33 }
 0x2a6   :  { %v1463_v52 = vrot.slane %v1455_v34, %v2617_v61 }
 0x2a7   :  { %v1470_v51 = vrot.slane %v1456_v50, %v2617_v61 }
 0x2a9   :  { %v1471_v53 = vcombine.low %v1463_v52, %v1470_v51 }
 0x2ab   :  { %v1478_v35 = vrot.slane %v1471_v53, %v2617_v61 }
 0x2ad   :  { %v1480_v16 = vmul.f32 %v2077_v23, %v1478_v35 }
 0x2af   :  { %v1485_v14 = vrot.slane %v1480_v16, %v2624_v6  ;;  %v1489_v22 = vrot.slane %v1480_v16, %v2627_v8  ;;  %v1493_v38 = vrot.slane %v1480_v16, %v2629_v9  ;;  %v1497_v39 = vrot.slane %v1480_v16, %v2631_v10 }
 0x2b1   :  { %v1502_v42 = vmul.f32 %v1485_v14, %v2687_v20  ;;  %v1503_v43 = vmul.f32 %v1489_v22, %v2691_v62  ;;  %v1504_v44 = vmul.f32 %v1493_v38, %v2689_v21  ;;  %v1505_v45 = vmul.f32 %v1497_v39, %v2693_v24 }
 0x2b2   :  { %v1543_v46 = vmul.f32 %v1497_v39, %v2681_v41  ;;  %v1537_v47 = vmul.f32 %v1489_v22, %v2667_v15  ;;  %v1541_v48 = vmul.f32 %v1489_v22, %v2679_v40  ;;  %v1539_v49 = vmul.f32 %v1497_v39, %v2669_v19  ;;  %v2078_v15 = vld [vmem:[%s2756_s4 + $0x3] ss:$4 sm:$0xf] }
 0x2b3   :  { %v1510_v54 = vcombine.low %v1502_v42, %v1503_v43  ;;  %v1511_v55 = vcombine.low %v1504_v44, %v1505_v45  ;;  %v1536_v56 = vmul.f32 %v1485_v14, %v2663_v18  ;;  %v1540_v20 = vmul.f32 %v1485_v14, %v2671_v36 }
 0x2b4   :  { %v1538_v62 = vmul.f32 %v1493_v38, %v2665_v17  ;;  %v1542_v21 = vmul.f32 %v1493_v38, %v2673_v37 }
 0x2b5   :  { %v1518_v24 = vrot.slane %v1510_v54, %v2617_v61  ;;  %v1525_v41 = vrot.slane %v1511_v55, %v2617_v61 }
 0x2b7   :  { %v1526_v57 = vcombine.low %v1518_v24, %v1525_v41 }
 0x2b9   :  { %v1533_v19 = vrot.slane %v1526_v57, %v2617_v61 }
 0x2bb   :  { %v1535_v40 = vsub.f32 %v2078_v15, %v1533_v19 }
 0x2bd   :  { %v1560_v18 = vrot.slane %v1535_v40, %v2631_v10  ;;  %v1552_v36 = vrot.slane %v1535_v40, %v2627_v8  ;;  %v1548_v17 = vrot.slane %v1535_v40, %v2624_v6  ;;  %v1556_v37 = vrot.slane %v1535_v40, %v2629_v9 }
 0x2bf   :  { %v1572_v58 = vadd.f32 %v1560_v18, %v1543_v46  ;;  %v1566_v59 = vadd.f32 %v1552_v36, %v1537_v47  ;;  %v1570_v60 = vadd.f32 %v1552_v36, %v1541_v48  ;;  %v1568_v63 = vadd.f32 %v1560_v18, %v1539_v49 }
 0x2c0   :  { %v1565_v0 = vadd.f32 %v1548_v17, %v1536_v56  ;;  %v1569_v1 = vadd.f32 %v1548_v17, %v1540_v20  ;;  %v1567_v2 = vadd.f32 %v1556_v37, %v1538_v62  ;;  %v1571_v3 = vadd.f32 %v1556_v37, %v1542_v21 }
 0x2c1   :  { %v1574_v4 = vmax.f32 %v1566_v59, 0.0  ;;  %v1578_v5 = vmax.f32 %v1570_v60, 0.0  ;;  %v1576_v61 = vmax.f32 %v1568_v63, 0.0  ;;  %v1580_v7 = vmax.f32 %v1572_v58, 0.0 }
 0x2c2   :  { %v1573_v11 = vmax.f32 %v1565_v0, 0.0  ;;  %v1577_v10 = vmax.f32 %v1569_v1, 0.0  ;;  %v1575_v12 = vmax.f32 %v1567_v2, 0.0  ;;  %v1579_v8 = vmax.f32 %v1571_v3, 0.0 }
 0x2c3   :  { %v1582_v13 = vpack.c.bf16 %v1578_v5, %v1574_v4  ;;  %v1584_v6 = vpack.c.bf16 %v1580_v7, %v1576_v61 }
 0x2c4   :  { %v1581_v25 = vpack.c.bf16 %v1577_v10, %v1573_v11  ;;  %v1583_v9 = vpack.c.bf16 %v1579_v8, %v1575_v12 }
 0x2c5   :  { %1880 = vmatprep.mubr.bf16.mxu0 %v1582_v13  ;;  %1921 = vmatprep.mubr.bf16.mxu1 %v1584_v6 }
 0x2c6   :  { %1881 = vmatmul.mubr.bf16.vlgmr.msra.gmra.mrb[8].mxu0 %v1581_v25  ;;  %1922 = vmatmul.mubr.bf16.vlgmr.msra.gmra.mrb[8].mxu1 %v1583_v9 }
 0x399   :  { %v2128_v26 = vpop.f32.mrb[8].mxu0  ;;  %v2150_v27 = vpop.f32.mrb[8].mxu1 }
 0x39a   :  { %v2129_v29 = vpop.f32.mrb[9].mxu0  ;;  %v2151_v30 = vpop.f32.mrb[9].mxu1 }
 0x39b   :  { %v2130_v31 = vadd.f32 %v2129_v29, %v2128_v26  ;;  %v2152_v32 = vadd.f32 %v2151_v30, %v2150_v27  ;;  %v2131_v33 = vpop.f32.mrb[10].mxu0  ;;  %v2153_v34 = vpop.f32.mrb[10].mxu1 }
 0x39c   :  { %v2132_v50 = vpop.f32.mrb[11].mxu0  ;;  %v2154_v52 = vpop.f32.mrb[11].mxu1 }
 0x39d   :  { %v1883_v51 = vadd.f32 %v2130_v31, %v2079_v28  ;;  %v2133_v53 = vadd.f32 %v2132_v50, %v2131_v33  ;;  %v2155_v23 = vadd.f32 %v2154_v52, %v2153_v34 }
 0x39f   :  { %v1924_v35 = vadd.f32 %v2152_v32, %v1883_v51  ;;  %v1886_v16 = vadd.f32 %v2133_v53, %v2079_v28 }
 0x3a1   :  { %1930 = vst [vmem:[%s2758_s6] sm:$0xff] %v1924_v35  ;;  %v1927_v14 = vadd.f32 %v2155_v23, %v1886_v16 }
 0x3a3   :  { %1931 = vst [vmem:[%s2758_s6 + $0x8] sm:$0xff] %v1927_v14 }
 0x3a4   :  { %1936 = vsyncpa [#allocation3], 1 }
 0x3a5   :  { %1937 = vsyncpa [#allocation5], 1 }

</bundles_post_ra>
